<compile_context>
chip_gen: v7x
topology: tpu7x:2x2x1
jax: 0.10.0
libtpu: 0.0.40
codegen_flags: <defaults>
</compile_context>

<pallas_src>
import functools

import jax
import jax.numpy as jnp
import numpy as np
from jax.experimental import pallas as pl
from jax.experimental.pallas import tpu as pltpu

# sys.float_info.epsilon (double precision machine eps), as in the PyTorch code.
_EPS = 2.220446049250313e-16
_LANE = 128


def _cdiv(a: int, b: int) -> int:
    return -(-a // b)


def _round_up(a: int, b: int) -> int:
    return _cdiv(a, b) * b


# ---------------------------------------------------------------------------
# PartitionLoss (across-head variance regularizer)
# ---------------------------------------------------------------------------

def _partition_loss_flat_kernel(x_ref, o_ref):
    """Fast path: whole flattened spatial axis fits one lane tile.

    Grid = (batch_blocks,).  Each step reads one contiguous (NB, num_head, S)
    HBM slab (single linear DMA) and reduces it straight into a per-block
    partial sum of squared deviations — no scratch, no pl.when guards.
    """
    x = x_ref[...].astype(jnp.float32)               # (NB, num_head, S) in f32
    d = x - jnp.mean(x, axis=1, keepdims=True)       # sublane (head) reduce
    ssd = jnp.sum(d * d)                             # raw SSD for this block
    # Lane-dense (1, 1, 128) output block; wrapper reads lane 0 only.
    o_ref[...] = jnp.full((1, 1, _LANE), ssd, dtype=jnp.float32)


def _partition_loss_acc_kernel(x_ref, o_ref, acc_ref):
    """General path (very large spatial axis): grid = (batch_blocks, lane_tiles)."""
    s = pl.program_id(1)

    @pl.when(s == 0)
    def _():
        acc_ref[...] = jnp.zeros_like(acc_ref)

    x = x_ref[...].astype(jnp.float32)               # (NB, num_head, tile)
    d = x - jnp.mean(x, axis=1, keepdims=True)
    acc_ref[...] += jnp.full((1, _LANE), jnp.sum(d * d), jnp.float32)

    @pl.when(s == pl.num_programs(1) - 1)
    def _():
        o_ref[...] = acc_ref[...].reshape(1, 1, _LANE)


def partition_loss(
    x: jax.Array,
    *,
    target_block_bytes: int = 512 * 1024,
    vmem_block_budget_bytes: int = 8 * 1024 * 1024,
    max_lanes_per_block: int | None = None,
) -> jax.Array:
    """Pallas implementation of PartitionLoss.forward.

    x: (B, num_head, *rest) -- e.g. (B, num_head, 16, 16) attention maps or
       (B, num_head, 512) head features.  Returns a scalar float32 loss.
    """
    num_head = int(x.shape[1])
    if num_head <= 1:
        # Matches the PyTorch "loss = 0" branch (static shape decision).
        return jnp.zeros((), jnp.float32)

    batch = int(x.shape[0])
    n_elem = 1
    for d in x.shape[2:]:
        n_elem *= int(d)
    n_elem = max(n_elem, 1)
    total_n = batch * n_elem            # elements torch's var.mean() averages over

    itemsize = x.dtype.itemsize
    # Sublane padding (review item): a (num_head, lanes) tile really occupies
    # ceil(num_head / min_sublane) * min_sublane sublanes of VMEM
    # (min_sublane = 8 for f32, 16 for bf16, 32 for int8/fp8).
    min_sublane = max(8, 32 // max(1, itemsize))
    padded_heads = _cdiv(num_head, min_sublane) * min_sublane

    # Free, contiguous reshape (no transpose, no extra HBM pass):
    # (B, num_head, *rest) -> (B, num_head, S).
    x3 = x.reshape(batch, num_head, n_elem)
    s_pad = _round_up(n_elem, _LANE)

    # Largest lane tile a single batch row may use, against the sublane-padded
    # VMEM budget for one pipelined input block.
    lane_cap = (vmem_block_budget_bytes // (padded_heads * itemsize)) // _LANE * _LANE
    lane_cap = max(_LANE, lane_cap)
    if max_lanes_per_block is not None:
        lane_cap = min(lane_cap, max(_LANE, (int(max_lanes_per_block) // _LANE) * _LANE))

    if s_pad <= lane_cap:
        tile, n_s = s_pad, 1            # common DAN case (S = 256 / 512)
    else:
        n_s = _cdiv(s_pad, lane_cap)
        tile = _cdiv(_cdiv(s_pad, _LANE), n_s) * _LANE
        n_s = _cdiv(s_pad, tile)
        s_pad = n_s * tile

    # Batch rows per block: contiguous (NB, num_head, tile) slabs sized toward
    # ~target_block_bytes of HBM per DMA, within the (padded) VMEM budget, and
    # keeping >= 2 batch blocks so v7x megacore can shard the parallel axis.
    row_hbm = num_head * tile * itemsize
    row_vmem = padded_heads * tile * itemsize
    nb = min(batch,
             max(1, vmem_block_budget_bytes // row_vmem),
             max(1, target_block_bytes // row_hbm))
    if batch >= 2:
        nb = min(nb, _cdiv(batch, 2))
    nb = max(1, nb)

    b_pad = _round_up(batch, nb)
    n_b = b_pad // nb

    if b_pad != batch or s_pad != n_elem:
        # Zero padding (extra batch rows and/or lanes) has zero across-head
        # deviation -> contributes exactly 0 SSD; the normalization below uses
        # the true element count.
        x3 = jnp.pad(x3, ((0, b_pad - batch), (0, 0), (0, s_pad - n_elem)))

    if n_s == 1:
        partials = pl.pallas_call(
            _partition_loss_flat_kernel,
            out_shape=jax.ShapeDtypeStruct((n_b, 1, _LANE), jnp.float32),
            grid_spec=pltpu.PrefetchScalarGridSpec(
                num_scalar_prefetch=0,
                grid=(n_b,),
                in_specs=[pl.BlockSpec((nb, num_head, tile), lambda i: (i, 0, 0))],
                out_specs=pl.BlockSpec((1, 1, _LANE), lambda i: (i, 0, 0)),
            ),
            compiler_params=pltpu.CompilerParams(
                dimension_semantics=("parallel",)),
        )(x3)
    else:
        partials = pl.pallas_call(
            _partition_loss_acc_kernel,
            out_shape=jax.ShapeDtypeStruct((n_b, 1, _LANE), jnp.float32),
            grid_spec=pltpu.PrefetchScalarGridSpec(
                num_scalar_prefetch=0,
                grid=(n_b, n_s),
                in_specs=[pl.BlockSpec((nb, num_head, tile),
                                       lambda i, s: (i, 0, s))],
                out_specs=pl.BlockSpec((1, 1, _LANE), lambda i, s: (i, 0, 0)),
                scratch_shapes=[pltpu.VMEM((1, _LANE), jnp.float32)],
            ),
            compiler_params=pltpu.CompilerParams(
                dimension_semantics=("parallel", "arbitrary")),
        )(x3)

    # Finalize (hoisted out of the kernel hot loop): sum per-block partials,
    # fold in 1/(num_head-1) and 1/total_n, add eps, take the log.
    total_ssd = jnp.sum(partials[:, 0, 0])
    mean_var = total_ssd / jnp.float32((num_head - 1) * total_n)
    return jnp.log(1.0 + jnp.float32(num_head) / (mean_var + jnp.float32(_EPS)))


# ---------------------------------------------------------------------------
# DAN head-fusion classifier tail:
#   heads (stacked) -> log_softmax over heads -> sum -> fc -> BatchNorm1d(eval)
# ---------------------------------------------------------------------------

def _dan_head_classifier_kernel(h_ref, w_ref, b_ref, g_ref, bt_ref, rm_ref, rv_ref,
                                logits_ref, hls_ref, *, bn_eps, apply_log_softmax):
    h = h_ref[...].astype(jnp.float32)                       # (num_head, B, D)
    if apply_log_softmax:                                    # torch: heads.size(1) > 1
        m = jnp.max(h, axis=0, keepdims=True)
        z = h - m
        lse = jnp.log(jnp.sum(jnp.exp(z), axis=0, keepdims=True))
        h = z - lse
    hls_ref[...] = h.astype(hls_ref.dtype)
    hsum = jnp.sum(h, axis=0)                                # (B, D)
    logits = jnp.dot(hsum, w_ref[...].astype(jnp.float32),
                     preferred_element_type=jnp.float32) + b_ref[...]
    # BatchNorm1d in eval mode (running statistics).
    inv = jax.lax.rsqrt(rv_ref[...].astype(jnp.float32) + bn_eps)
    out = (logits - rm_ref[...]) * inv * g_ref[...] + bt_ref[...]
    logits_ref[...] = out.astype(logits_ref.dtype)


def dan_head_classifier(heads_stacked, fc_w, fc_b, bn_gamma, bn_beta,
                        bn_mean, bn_var, *, bn_eps: float = 1e-5):
    """Tail of DAN.forward after the CrossAttentionHeads.

    heads_stacked: (num_head, B, 512) -- torch.stack(heads) layout.
    fc_w: (512, num_class); fc_b / bn_*: (num_class,).
    Returns (logits (B, num_class), heads_log_softmax (B, num_head, 512)).
    """
    num_head, batch, dim = (int(s) for s in heads_stacked.shape)
    num_class = int(fc_w.shape[1])
    as2d = lambda v: v.reshape(1, num_class).astype(jnp.float32)

    kernel = functools.partial(_dan_head_classifier_kernel,
                               bn_eps=float(bn_eps),
                               apply_log_softmax=num_head > 1)
    # Small single-block kernel: whole arrays live in VMEM (B*num_head*512 is
    # tiny next to the backbone activations); tile the batch axis if B grows.
    logits, heads_ls = pl.pallas_call(
        kernel,
        out_shape=(jax.ShapeDtypeStruct((batch, num_class), jnp.float32),
                   jax.ShapeDtypeStruct((num_head, batch, dim), jnp.float32)),
    )(heads_stacked, fc_w, as2d(fc_b), as2d(bn_gamma), as2d(bn_beta),
      as2d(bn_mean), as2d(bn_var))
    # Match the torch layout: stack(...).permute([1, 0, 2]) -> (B, num_head, D).
    return logits, jnp.transpose(heads_ls, (1, 0, 2))


# ---------------------------------------------------------------------------
# Pure-numpy references (torch semantics)
# ---------------------------------------------------------------------------

def _reference_partition_loss(x: np.ndarray) -> float:
    num_head = x.shape[1]
    if num_head <= 1:
        return 0.0
    var = np.var(np.asarray(x, np.float64), axis=1, ddof=1)
    mean_var = var.mean()
    return float(np.log(1.0 + num_head / (mean_var + _EPS)))


def _reference_dan_head_tail(heads_stacked, fc_w, fc_b, gamma, beta, rmean, rvar,
                             eps=1e-5):
    h = np.asarray(heads_stacked, np.float64)            # (NH, B, D)
    hp = np.transpose(h, (1, 0, 2))                      # (B, NH, D)
    if hp.shape[1] > 1:
        m = hp.max(axis=1, keepdims=True)
        hp = hp - m - np.log(np.exp(hp - m).sum(axis=1, keepdims=True))
    hsum = hp.sum(axis=1)
    logits = hsum @ np.asarray(fc_w, np.float64) + np.asarray(fc_b, np.float64)
    out = ((logits - np.asarray(rmean, np.float64))
           / np.sqrt(np.asarray(rvar, np.float64) + eps)
           * np.asarray(gamma, np.float64) + np.asarray(beta, np.float64))
    return out.astype(np.float32), hp.astype(np.float32)


if __name__ == "__main__":
    key = jax.random.PRNGKey(0)
    k1, k2, k3, k4, k5 = jax.random.split(key, 5)

    # ---- PartitionLoss: (batch=2, num_head=4, 16, 16) attention maps ----
    x = jax.random.normal(k1, (2, 4, 16, 16), dtype=jnp.float32)
    ref = _reference_partition_loss(np.asarray(x))

    loss = jax.block_until_ready(partition_loss(x))                 # fast path
    assert np.allclose(float(loss), ref, rtol=1e-4, atol=1e-5), (float(loss), ref)

    # Force the multi-lane-tile accumulator path (n_s > 1).
    loss_mt = jax.block_until_ready(partition_loss(x, max_lanes_per_block=128))
    assert np.allclose(float(loss_mt), ref, rtol=1e-4, atol=1e-5), (float(loss_mt), ref)

    # Exercise batch packing (NB > 1) plus batch/lane zero padding.
    x2 = jax.random.normal(k2, (5, 4, 8, 8), dtype=jnp.float32)
    ref2 = _reference_partition_loss(np.asarray(x2))
    loss2 = jax.block_until_ready(partition_loss(x2))
    assert np.allclose(float(loss2), ref2, rtol=1e-4, atol=1e-5), (float(loss2), ref2)

    # bf16 stays bf16 through the DMA; the f32 cast happens in-kernel.
    xb = x.astype(jnp.bfloat16)
    ref_b = _reference_partition_loss(np.asarray(xb.astype(jnp.float32)))
    loss_b = jax.block_until_ready(partition_loss(xb))
    assert np.allclose(float(loss_b), ref_b, rtol=1e-3, atol=1e-4), (float(loss_b), ref_b)

    # ---- DAN head-fusion classifier tail: B=2, num_head=4, D=512, classes=7 ----
    B, NH, D, C = 2, 4, 512, 7
    heads = jax.random.normal(k3, (NH, B, D), dtype=jnp.float32) * 0.5
    fc_w = jax.random.normal(k4, (D, C), dtype=jnp.float32) * 0.02
    fc_b = jnp.zeros((C,), jnp.float32)
    gamma = jnp.ones((C,), jnp.float32)
    beta = jnp.zeros((C,), jnp.float32)
    rmean = jax.random.normal(k5, (C,), dtype=jnp.float32) * 0.1
    rvar = jnp.ones((C,), jnp.float32) * 1.5

    logits, heads_ls = dan_head_classifier(heads, fc_w, fc_b, gamma, beta, rmean, rvar)
    logits = jax.block_until_ready(logits)
    heads_ls = jax.block_until_ready(heads_ls)
    ref_logits, ref_hls = _reference_dan_head_tail(
        np.asarray(heads), np.asarray(fc_w), np.asarray(fc_b), np.asarray(gamma),
        np.asarray(beta), np.asarray(rmean), np.asarray(rvar))
    assert np.allclose(np.asarray(heads_ls), ref_hls, rtol=1e-4, atol=1e-4)
    # Looser tolerance on logits: MXU matmul precision vs float64 reference.
    assert np.allclose(np.asarray(logits), ref_logits, rtol=5e-2, atol=5e-2), (
        np.asarray(logits), ref_logits)

    print("KERNEL_OK")
</pallas_src>

<mosaic_0001>
module attributes {stable_mosaic.version = 11 : i64} {
  func.func @_partition_loss_flat_kernel(%arg0: i32, %arg1: memref<1x4x256xf32, #tpu.memory_space<vmem>>, %arg2: memref<1x1x128xf32, #tpu.memory_space<vmem>>) attributes {dimension_semantics = [#tpu.dimension_semantics<parallel>], iteration_bounds = array<i64: 2>, scalar_prefetch = 0 : i64, scratch_operands = 0 : i64, tpu.core_type = #tpu.core_type<tc>, window_params = [{transform_indices = @transform_0, window_bounds = array<i64: 1, 4, 256>}, {transform_indices = @transform_1, window_bounds = array<i64: 1, 1, 128>}]} {
    %c0 = arith.constant 0 : index
    %c0_0 = arith.constant 0 : index
    %c0_1 = arith.constant 0 : index
    %0 = vector.load %arg1[%c0, %c0_0, %c0_1] : memref<1x4x256xf32, #tpu.memory_space<vmem>>, vector<1x4x256xf32>
    %cst = arith.constant dense<0.000000e+00> : vector<1x256xf32>
    %1 = vector.multi_reduction <add>, %0, %cst [1] : vector<1x4x256xf32> to vector<1x256xf32>
    %2 = vector.shape_cast %1 : vector<1x256xf32> to vector<1x1x256xf32>
    %cst_2 = arith.constant 4.000000e+00 : f32
    %3 = vector.broadcast %cst_2 : f32 to vector<1x1x256xf32>
    %4 = arith.divf %2, %3 : vector<1x1x256xf32>
    %5 = vector.broadcast %4 : vector<1x1x256xf32> to vector<1x4x256xf32>
    %6 = arith.subf %0, %5 : vector<1x4x256xf32>
    %7 = arith.mulf %6, %6 : vector<1x4x256xf32>
    %8 = vector.shape_cast %7 : vector<1x4x256xf32> to vector<1x1x4x256xf32>
    %cst_3 = arith.constant dense<0.000000e+00> : vector<1xf32>
    %9 = vector.multi_reduction <add>, %8, %cst_3 [1, 2, 3] : vector<1x1x4x256xf32> to vector<1xf32>
    %10 = vector.shape_cast %9 : vector<1xf32> to vector<1x1x1x1xf32>
    %11 = vector.extract %10[0, 0, 0, 0] : f32 from vector<1x1x1x1xf32>
    %12 = vector.broadcast %11 : f32 to vector<1x1x128xf32>
    %c0_4 = arith.constant 0 : index
    %c0_5 = arith.constant 0 : index
    %c0_6 = arith.constant 0 : index
    %13 = vector.load %arg2[%c0_4, %c0_5, %c0_6] : memref<1x1x128xf32, #tpu.memory_space<vmem>>, vector<1x1x128xf32>
    tpu.vector_store %arg2[%c0_4, %c0_5, %c0_6], %12 {strides = array<i32>} : memref<1x1x128xf32, #tpu.memory_space<vmem>>, vector<1x1x128xf32>,
    return
  }
  func.func @transform_0(%arg0: i32) -> (i32, i32, i32) {
    %c0_i32 = arith.constant 0 : i32
    %c0_i32_0 = arith.constant 0 : i32
    %c0_i32_1 = arith.constant 0 : i32
    return %arg0, %c0_i32, %c0_i32_0 : i32, i32, i32
  }
  func.func @transform_1(%arg0: i32) -> (i32, i32, i32) {
    %c0_i32 = arith.constant 0 : i32
    %c0_i32_0 = arith.constant 0 : i32
    %c0_i32_1 = arith.constant 0 : i32
    return %arg0, %c0_i32, %c0_i32_0 : i32, i32, i32
  }
}

</mosaic_0001>

<bundles_post_ra>
// kernel: tpu_custom_call.1
= control target key start
LH: loop header
LB: loop body
LE: loop exit
PB: predicated region body
PF: predicated region fallthrough
CT: control target
= control target key end

     0   :  { %6 = vsyncpa [#allocation3], 0  ;;  %s593_s0 = inlined_call_operand.hbm [shape: f32[2,4,256], index: 0, kind: input, shape index: {}]   ;;  %s594_s1 = inlined_call_operand.hbm [shape: f32[2,1,128], index: 1, kind: output, shape index: {}]  }
   0x1   :  { %8 = vsyncpa [#allocation3 + $0x1], 0 }
   0x2   :  { %9 = vsyncpa [#allocation4], 0 }
   0x3   :  { %11 = vsyncpa [#allocation4 + $0x1], 0  ;;  %s427_s6 = smov 0   ;;  %s429_s7 = smov 0  }
   0x4   :  { %s431_s8 = smov 0   ;;  %s433_s9 = smov 0  }
   0x5 LB: > { %s448_s10 = sadd.s32 4294967295, %s413_s9   ;;  %s256_s11 = sadd.s32 4294967294, %s413_s9   ;;  %s413_s9 = sphi %s433_s9, %s609_s9   ;;  %s409_s8 = sphi %s431_s8, %s608_s8   ;;  %s405_s7 = sphi %s429_s7, %s607_s7   ;;  %s401_s6 = sphi %s427_s6, %s606_s6  }
   0x6   : > { %s452_s12 = sadd.s32 1, %s413_s9   ;;  %s24_s13 = sadd.s32 1, %s409_s8 }
   0x7   : > { %s21_s14 = ssub.s32 %s413_s9, %s452_s12  ;;  %p31_p0 = scmp.ne.s32.totalorder %s409_s8, %s405_s7 }
   0x8   : > { %p22_p1 = scmp.eq.s32.totalorder %s21_s14, 0  ;;  %p32_p2 = scmp.eq.s32.totalorder %s413_s9, 0 }
   0x9   : > { %p37_p3 = scmp.ne.s32.totalorder %s405_s7, %s401_s6  ;;  %p38_p4 = scmp.eq.s32.totalorder %s448_s10, 0 }
   0xa   : > { %s464_s15 = scalar_select %p22_p1, %s409_s8, %s24_s13  }
   0xb   : > { %p466_p5 = por %p32_p2, %p31_p0  ;;  %p470_p6 = por %p38_p4, %p37_p3 }
   0xc   : > { %p61_p7 = scmp.eq.s32.totalorder %s448_s10, 1  ;;  %p67_p8 = scmp.eq.s32.totalorder %s256_s11, 1 }
   0xd   : > { %p282_p10 = scmp.lt.s32.totalorder %s413_s9, 2  ;;  %s87_s20 = sand.u32 1, %s409_s8  }
   0xe   : > { %p477_p11 = por %p61_p7, %p31_p0  ;;  %p481_p12 = por %p67_p8, %p37_p3 }
   0xf   : > { %s267_s21 = sshll.u32 %s413_s9, 7  ;;  %s259_s22 = sshll.u32 %s87_s20, 3 }
  0x10   : > { %s598_s18 = scalar_select %p477_p11, 1, 0 }
  0x11   : > { %s599_s19 = scalar_select %p481_p12, 1, 0 }
  0x12   : > { %s490_s25 = scalar_lea.hbm %s593_s0, %s267_s21  ;;  %s91_s26 = scalar_lea.vmem [#allocation2], %s259_s22 }
  0x13   : > { %s99_s27 = sshll.u32 %s91_s26, 4  ;;  %p494_p13 = pnand %p282_p10, %p466_p5  ;;  %s498_s27 = int_to_ptr.vmem [resolvable:$true] %s99_s27 }
  0x14   : > { %s88_s29 = scalar_lea.sflag [#allocation3], %s87_s20  ;;  %s317_s30 = scalar_lea.hbm %s490_s25, 128 }
  0x15   : > { %p318_p2 = scmp.ne.s32.totalorder %s490_s25, %s317_s30  ;;  %p319_p3 = pneg %p494_p13 }
  0x16   : > { %s322_s4 = scalar_lea.hbm %s593_s0, 256  ;;  %p323_p5 = scmp.lt.u32.totalorder %s490_s25, %s593_s0 }
  0x17   : > { %p320_p4 = pnand %p319_p3, %p318_p2  ;;  %p324_p8 = scmp.lt.u32.totalorder %s322_s4, %s317_s30 }
  0x18   : > { %p326_p9 = scmp.lt.u32.totalorder %s317_s30, %s490_s25 }
  0x19   : > { %p321_p7 = pneg %p320_p4  ;;  %p325_p10 = por %p324_p8, %p323_p5 }
  0x1b   : > { %p327_p0 = por %p326_p9, %p325_p10 }
  0x1d   : > { %p328_p1 = pnand %p327_p0, %p321_p7 }
  0x1f   : > { %331 = shalt.err (!%p328_p1)
}
  0x20   : > { %s332_s13 = scalar_lea.vmem %s498_s27, 128  ;;  %s415_s14 = smov [#allocation2]  }
  0x21   : > { %p333_p2 = scmp.ne.s32.totalorder %s498_s27, %s332_s13  ;;  %s337_s16 = sshll.u32 %s415_s14, 4  ;;  %s338_s16 = int_to_ptr.vmem [resolvable:$false] %s337_s16 }
  0x22   : > { %s339_s20 = scalar_lea.vmem %s338_s16, 256  ;;  %p340_p11 = scmp.lt.s32.totalorder %s498_s27, %s338_s16 }
  0x23   : > { %p335_p4 = pnand %p333_p2, %p319_p3  ;;  %p341_p5 = scmp.lt.s32.totalorder %s339_s20, %s332_s13 }
  0x25   : > { %p336_p12 = pneg %p335_p4  ;;  %p342_p8 = por %p341_p5, %p340_p11 }
  0x27   : > { %p343_p9 = pnand %p342_p8, %p336_p12 }
  0x29   : > { %346 = shalt.err (!%p343_p9)
}
  0x2a   : > { %277 = dma.hbm_to_vmem [thread:$0]  (!%p494_p13), %s490_s25, 128, %s498_s27, %s88_s29  }
  0x2b   : > { %p601_p0 = scmp.lt.s32.totalorder %s413_s9, 3  ;;  %p602_p1 = scmp.ge.s32.totalorder %s413_s9, 1 }
  0x2d   : > { %p105_p3 = pnand %p602_p1, %p601_p0 }
  0x2e   : > { %s532_s21 = sand.u32 (!%p105_p3), 1, %s405_s7  }
  0x2f   : > { %108 = sbr.rel (%p105_p3) target bundleno = 303 (0x12f), region = 24  ;;  %s263_s22 = sshll.u32 (!%p105_p3), %s532_s21, 3 }
  0x30   : > { %s111_s23 = scalar_lea.sflag (!%p105_p3), [#allocation3], %s532_s21  ;;  %s114_s24 = scalar_lea.vmem (!%p105_p3), [#allocation2], %s263_s22 }
  0x36   : > { %392 = dma.done.wait (%p470_p6), %s111_s23, 128  }
  0x37   : > { %394 = vsyncadd (%p470_p6), %s111_s23, 4294967168  ;;  %vm136_vm0 = vcmask 1043456   ;;  %v132_v0 = vld [vmem:[%s114_s24] sm:$0xff]  ;;  %s131_s17 = scalar_lea.vmem [#allocation5], %s532_s21  ;;  %s264_s26 = sshll.u32 %s448_s10, 4 }
  0x38   : > { %v134_v1 = vcombine.high %v132_v0, %v132_v0  ;;  %v137_v2 = vsel %vm136_vm0, %v132_v0, 0.0  ;;  %s190_s25 = sshll.u32 %s131_s17, 4  ;;  %s551_s30 = scalar_lea.hbm %s594_s1, %s264_s26  ;;  %s546_s25 = int_to_ptr.vmem [resolvable:$true] %s190_s25 }
  0x39   : > { %v138_v3 = vrot.slane %v137_v2, 4  ;;  %s178_s2 = scalar_lea.sflag [#allocation4], %s532_s21  ;;  %s347_s3 = scalar_lea.vmem %s546_s25, 16 }
  0x3a   : > { %v144_v4 = vsel %vm136_vm0, %v134_v1, 0.0  ;;  %p348_p6 = scmp.ne.s32.totalorder %s546_s25, %s347_s3  ;;  %p603_p11 = scmp.ne.s32.totalorder %s598_s18, 0 }
  0x3b   : > { %v139_v5 = vadd.f32 %v138_v3, %v137_v2  ;;  %v145_v6 = vrot.slane %v144_v4, 4  ;;  %s416_s10 = smov [#allocation5]  }
  0x3c   : > { %p349_p12 = pnand %p348_p6, %p603_p11  ;;  %s351_s4 = sshll.u32 %s416_s10, 4  ;;  %s352_s4 = int_to_ptr.vmem [resolvable:$false] %s351_s4 }
  0x3d   : > { %v140_v7 = vrot.slane %v139_v5, 2  ;;  %v146_v8 = vadd.f32 %v145_v6, %v144_v4  ;;  %s353_s5 = scalar_lea.vmem %s352_s4, 32  ;;  %p354_p7 = scmp.lt.s32.totalorder %s546_s25, %s352_s4 }
  0x3e   : > { %p350_p13 = pneg %p349_p12  ;;  %p355_p10 = scmp.lt.s32.totalorder %s353_s5, %s347_s3 }
  0x3f   : > { %v141_v9 = vadd.f32 %v140_v7, %v139_v5  ;;  %v147_v10 = vrot.slane %v146_v8, 2 }
  0x40   : > { %p356_p2 = por %p355_p10, %p354_p7 }
  0x41   : > { %v142_v11 = vrot.slane %v141_v9, 1  ;;  %v148_v12 = vadd.f32 %v147_v10, %v146_v8 }
  0x42   : > { %p357_p4 = pnand %p356_p2, %p350_p13 }
  0x43   : > { %v143_v13 = vadd.f32 %v142_v11, %v141_v9  ;;  %v149_v14 = vrot.slane %v148_v12, 1 }
  0x45   : > { %v150_v15 = vadd.f32 %v149_v14, %v148_v12  ;;  %v152_v16 = vmul.f32 0.25, %v143_v13 }
  0x47   : > { %v153_v17 = vmul.f32 0.25, %v150_v15 }
  0x49   : > { %v156_v18 = vcombine.low %v152_v16, %v153_v17 }
  0x4b   : > { %v158_v19 = vsub.f32 %v132_v0, %v156_v18 }
  0x4d   : > { %v159_v20 = vmul.f32 %v158_v19, %v158_v19 }
  0x4f   : > { %v161_v21 = vcombine.high %v159_v20, %v159_v20  ;;  %v163_v22 = vsel %vm136_vm0, %v159_v20, 0.0 }
  0x51   : > { %v164_v23 = vsel %vm136_vm0, %v161_v21, 0.0 }
  0x52   : > { %v165_v24 = vadd.f32 %v164_v23, %v163_v22 }
  0x54   : > { %166 = vadd.xlane.f32.xlu0 %v165_v24 }
  0xe1   : > { %v167_v25 = vpop.xlane.xlu0 %166 }
  0xe2   : > { %v168_v26 = vrot.slane %v167_v25, 4 }
  0xe4   : > { %v169_v27 = vadd.f32 %v168_v26, %v167_v25 }
  0xe6   : > { %v170_v28 = vrot.slane %v169_v27, 2 }
  0xe8   : > { %v171_v29 = vadd.f32 %v170_v28, %v169_v27 }
  0xea   : > { %v172_v30 = vrot.slane %v171_v29, 1 }
  0xec   : > { %v173_v31 = vadd.f32 %v172_v30, %v171_v29 }
  0xee   : > { %268 = vpush %v173_v31 }
 0x11f   : > { %s269_s27 = spop %268 }
 0x120   : > { %v175_v32 = vstv %s269_s27 }
 0x121   : > { %176 = vst [vmem:[%s131_s17] sm:$0x1] %v175_v32 }
 0x122   : > { %360 = shalt.err (!%p357_p4)
}
 0x123   : > { %s361_s11 = scalar_lea.hbm %s551_s30, 16  ;;  %s365_s16 = scalar_lea.hbm %s594_s1, 32 }
 0x124   : > { %p362_p5 = scmp.ne.s32.totalorder %s551_s30, %s361_s11  ;;  %p366_p0 = scmp.lt.u32.totalorder %s551_s30, %s594_s1 }
 0x125   : > { %p367_p1 = scmp.lt.u32.totalorder %s365_s16, %s361_s11  ;;  %p369_p6 = scmp.lt.u32.totalorder %s361_s11, %s551_s30 }
 0x126   : > { %p363_p8 = pnand %p362_p5, %p603_p11 }
 0x127   : > { %p368_p3 = por %p367_p1, %p366_p0 }
 0x128   : > { %p364_p9 = pneg %p363_p8 }
 0x129   : > { %p370_p12 = por %p369_p6, %p368_p3 }
 0x12b   : > { %p371_p13 = pnand %p370_p12, %p364_p9 }
 0x12d   : > { %374 = shalt.err (!%p371_p13)
}
 0x12e   : > { %272 = dma.vmem_to_hbm [thread:$0]  (%p603_p11), %s546_s25, 16, %s551_s30, %s178_s2  }
 0x12f PF: > { %s202_s22 = sand.u32 1, %s401_s6   ;;  %p604_p7 = scmp.ne.s32.totalorder %s599_s19, 0 }
 0x130   : > { %p605_p10 = scmp.ge.s32.totalorder %s413_s9, 2  ;;  %s203_s23 = scalar_lea.sflag [#allocation4], %s202_s22 }
 0x132   : > { %p279_p2 = pnand %p605_p10, %p604_p7 }
 0x134   : > { %396 = dma.done.wait (!%p279_p2), %s203_s23, 16  }
 0x135   : > { %398 = vsyncadd (!%p279_p2), %s203_s23, 4294967280  ;;  %p14_p4 = scmp.ge.s32.totalorder %s452_s12, 4   ;;  %s606_s6 = smov %s405_s7 }
 0x136   : > { %s607_s7 = smov %s409_s8  ;;  %s608_s8 = smov %s464_s15 }
 0x137   : > { %s609_s9 = smov %s452_s12  ;;  %16 = sbr.rel (!%p14_p4) target bundleno = 5 (0x5), region = 69 }
 0x13e   :  { %207 = vsyncpa [#allocation3], 1 }
 0x13f   :  { %209 = vsyncpa [#allocation3 + $0x1], 1 }
 0x140   :  { %210 = vsyncpa [#allocation4], 1 }
 0x141   :  { %212 = vsyncpa [#allocation4 + $0x1], 1 }

</bundles_post_ra>
